<compile_context>
chip_gen: v5e
topology: v5e:2x2
jax: 0.10.0
libtpu: 0.0.40
codegen_flags: <defaults>
</compile_context>

<pallas_src>
import functools

import jax
import jax.numpy as jnp
from jax.experimental import pallas as pl
from jax.experimental.pallas import tpu as pltpu

_LANES = 128
_SUBLANES = 8


def _round_up(x, m):
    return (x + m - 1) // m * m


def _normhead_kernel(x_ref, w1_ref, b1_ref, w2_ref, b2_ref, w3_ref, b3_ref,
                     w4_ref, b4_ref, o_ref, *, tile_m, batch):
    # Three hidden layers: MXU matmul (f32 accumulate) + VPU bias/ReLU.
    h = jnp.dot(x_ref[...], w1_ref[...], preferred_element_type=jnp.float32)
    h = jnp.maximum(h + b1_ref[...], 0.0)
    h = jnp.dot(h, w2_ref[...], preferred_element_type=jnp.float32)
    h = jnp.maximum(h + b2_ref[...], 0.0)
    h = jnp.dot(h, w3_ref[...], preferred_element_type=jnp.float32)
    h = jnp.maximum(h + b3_ref[...], 0.0)

    # Final (H -> 1) linear fused as VPU multiply + lane reduction (no MXU pass).
    # w4 is kept in PyTorch (out, in) == (1, H) layout and used as a row.
    col = jnp.sum(h * w4_ref[...], axis=-1, keepdims=True) + b4_ref[...]   # (TM, 1)

    if batch % tile_m != 0:
        # Zero out contributions from zero-padded rows (a zero row would still
        # contribute relu(b1)...-derived terms to the norm otherwise).
        row = pl.program_id(0) * tile_m + jax.lax.broadcasted_iota(
            jnp.int32, col.shape, 0)
        col = jnp.where(row < batch, col, 0.0)

    partial = jnp.sum(col * col, axis=0, keepdims=True)                    # (1, 1)

    # Lane-dense, unmasked full-vreg store of this tile's partial sum of squares.
    # The wrapper reads [i, 0, 0], sums the per-tile partials and takes the sqrt.
    o_ref[...] = jnp.broadcast_to(partial.reshape(1, 1, 1), o_ref.shape)


def normhead_norm_loss(feats, params, *, tile_m=None):
    """NormHead MLP + Frobenius-norm reduction as a batch-tiled Pallas kernel.

    feats:  (B, num_classes) float32 (the backbone's final logits)
    params: dict with w1..w3 transposed to (in, out), w4 in (1, hidden) layout,
            b1..b4 of shape (1, out).
    returns: scalar float32 (the 'Norm' loss).
    """
    batch, in_size = feats.shape
    hidden = params["w1"].shape[1]

    if tile_m is None:
        # Biggest tile that respects the (8,*) sublane constraint while keeping
        # double-buffered feats tiles + activations tiny vs. VMEM (v7x: 64 MiB
        # physical / 32 MiB scoped default).
        tile_m = min(512, _round_up(batch, _SUBLANES))
    tile_m = _round_up(tile_m, _SUBLANES)
    b_pad = _round_up(batch, tile_m)
    num_tiles = b_pad // tile_m

    if b_pad != batch:
        feats = jnp.pad(feats, ((0, b_pad - batch), (0, 0)))

    kernel = functools.partial(_normhead_kernel, tile_m=tile_m, batch=batch)

    operands = (feats,
                params["w1"], params["b1"],
                params["w2"], params["b2"],
                params["w3"], params["b3"],
                params["w4"], params["b4"])

    # feats: one (tile_m, in_size) block per grid step (auto double-buffered).
    # params: constant block index -> fetched once and kept VMEM-resident.
    in_specs = [pl.BlockSpec((tile_m, in_size), lambda i: (i, 0))]
    for p in operands[1:]:
        in_specs.append(pl.BlockSpec(p.shape, lambda i: (0, 0)))

    flops = 2 * b_pad * (in_size * hidden + 2 * hidden * hidden + hidden)
    bytes_accessed = (sum(int(a.size) * 4 for a in operands)
                      + num_tiles * _SUBLANES * _LANES * 4)

    out = pl.pallas_call(
        kernel,
        out_shape=jax.ShapeDtypeStruct((num_tiles, _SUBLANES, _LANES),
                                       jnp.float32),
        grid_spec=pltpu.PrefetchScalarGridSpec(
            num_scalar_prefetch=0,
            grid=(num_tiles,),
            in_specs=in_specs,
            out_specs=pl.BlockSpec((1, _SUBLANES, _LANES),
                                   lambda i: (i, 0, 0)),
        ),
        compiler_params=pltpu.CompilerParams(
            dimension_semantics=("parallel",)),
        cost_estimate=pl.CostEstimate(
            flops=flops, transcendentals=0, bytes_accessed=bytes_accessed),
    )(*operands)

    # Per-tile partial sums reduced in f32 here; sqrt taken exactly once.
    return jnp.sqrt(jnp.sum(out[:, 0, 0]))


def init_params(key, num_classes, hidden_dim=32, out_size=1):
    """Mimics nn.Linear default init (uniform +-1/sqrt(fan_in)).

    w1..w3 are stored transposed, shape (in, out), so the kernel does x @ W.
    w4 is kept in PyTorch layout (out, in) == (1, hidden) and used as a row
    for the fused VPU reduction. Biases are (1, out).
    """
    params = {}
    layer_dims = [(num_classes, hidden_dim),
                  (hidden_dim, hidden_dim),
                  (hidden_dim, hidden_dim)]
    for idx, (fan_in, fan_out) in enumerate(layer_dims, start=1):
        key, kw, kb = jax.random.split(key, 3)
        bound = 1.0 / jnp.sqrt(jnp.float32(fan_in))
        params[f"w{idx}"] = jax.random.uniform(
            kw, (fan_in, fan_out), jnp.float32, -bound, bound)
        params[f"b{idx}"] = jax.random.uniform(
            kb, (1, fan_out), jnp.float32, -bound, bound)
    key, kw, kb = jax.random.split(key, 3)
    bound = 1.0 / jnp.sqrt(jnp.float32(hidden_dim))
    params["w4"] = jax.random.uniform(
        kw, (out_size, hidden_dim), jnp.float32, -bound, bound)
    params["b4"] = jax.random.uniform(
        kb, (1, out_size), jnp.float32, -bound, bound)
    return params


def _reference_norm_loss(feats, params):
    h = jnp.maximum(feats @ params["w1"] + params["b1"], 0.0)
    h = jnp.maximum(h @ params["w2"] + params["b2"], 0.0)
    h = jnp.maximum(h @ params["w3"] + params["b3"], 0.0)
    out = h @ params["w4"].T + params["b4"]
    return jnp.sqrt(jnp.sum(out * out))


if __name__ == "__main__":
    num_classes = 10   # MLP in_size = num_classes
    hidden_dim = 32

    key = jax.random.PRNGKey(0)
    key, kp = jax.random.split(key)
    params = init_params(kp, num_classes, hidden_dim)

    # (batch, tile_m): exact-fit single tile, padded single tile, and a padded
    # multi-tile case that exercises the 'parallel' batch grid + resident weights.
    for batch, tile_m in ((8, None), (20, None), (40, 16)):
        key, kf = jax.random.split(key)
        # feats plays the role of base_features[-1]: backbone logits (B, C).
        feats = jax.random.normal(kf, (batch, num_classes), jnp.float32)
        loss = jax.block_until_ready(
            normhead_norm_loss(feats, params, tile_m=tile_m))
        ref = jax.block_until_ready(_reference_norm_loss(feats, params))
        assert jnp.allclose(loss, ref, rtol=1e-5, atol=1e-5), (batch, loss, ref)

    print("KERNEL_OK")
</pallas_src>

<mosaic_0001>
module attributes {stable_mosaic.version = 11 : i64} {
  func.func @_normhead_kernel(%arg0: i32, %arg1: memref<8x10xf32, #tpu.memory_space<vmem>>, %arg2: memref<10x32xf32, #tpu.memory_space<vmem>>, %arg3: memref<1x32xf32, #tpu.memory_space<vmem>>, %arg4: memref<32x32xf32, #tpu.memory_space<vmem>>, %arg5: memref<1x32xf32, #tpu.memory_space<vmem>>, %arg6: memref<32x32xf32, #tpu.memory_space<vmem>>, %arg7: memref<1x32xf32, #tpu.memory_space<vmem>>, %arg8: memref<1x32xf32, #tpu.memory_space<vmem>>, %arg9: memref<1x1xf32, #tpu.memory_space<vmem>>, %arg10: memref<1x8x128xf32, #tpu.memory_space<vmem>>) attributes {dimension_semantics = [#tpu.dimension_semantics<parallel>], iteration_bounds = array<i64: 1>, scalar_prefetch = 0 : i64, scratch_operands = 0 : i64, tpu.core_type = #tpu.core_type<tc>, window_params = [{transform_indices = @transform_0, window_bounds = array<i64: 8, 10>}, {pipeline_mode = #tpu.pipeline_mode<synchronous>, transform_indices = @transform_1, window_bounds = array<i64: 10, 32>}, {pipeline_mode = #tpu.pipeline_mode<synchronous>, transform_indices = @transform_2, window_bounds = array<i64: 1, 32>}, {pipeline_mode = #tpu.pipeline_mode<synchronous>, transform_indices = @transform_3, window_bounds = array<i64: 32, 32>}, {pipeline_mode = #tpu.pipeline_mode<synchronous>, transform_indices = @transform_4, window_bounds = array<i64: 1, 32>}, {pipeline_mode = #tpu.pipeline_mode<synchronous>, transform_indices = @transform_5, window_bounds = array<i64: 32, 32>}, {pipeline_mode = #tpu.pipeline_mode<synchronous>, transform_indices = @transform_6, window_bounds = array<i64: 1, 32>}, {pipeline_mode = #tpu.pipeline_mode<synchronous>, transform_indices = @transform_7, window_bounds = array<i64: 1, 32>}, {pipeline_mode = #tpu.pipeline_mode<synchronous>, transform_indices = @transform_8, window_bounds = array<i64: 1, 1>}, {transform_indices = @transform_9, window_bounds = array<i64: 1, 8, 128>}]} {
    %c0 = arith.constant 0 : index
    %c0_0 = arith.constant 0 : index
    %0 = vector.load %arg1[%c0, %c0_0] : memref<8x10xf32, #tpu.memory_space<vmem>>, vector<8x10xf32>
    %c0_1 = arith.constant 0 : index
    %c0_2 = arith.constant 0 : index
    %1 = vector.load %arg2[%c0_1, %c0_2] : memref<10x32xf32, #tpu.memory_space<vmem>>, vector<10x32xf32>
    %cst = arith.constant dense<0.000000e+00> : vector<8x32xf32>
    %2 = tpu.matmul %0, %1, %cst {dimension_numbers = #tpu.dot_dimension_numbers<[1], [0], [0], [1], [0, 0, 1, 1], [], []>} : vector<8x10xf32>, vector<10x32xf32>, vector<8x32xf32> -> vector<8x32xf32>
    %c0_3 = arith.constant 0 : index
    %c0_4 = arith.constant 0 : index
    %3 = vector.load %arg3[%c0_3, %c0_4] : memref<1x32xf32, #tpu.memory_space<vmem>>, vector<1x32xf32>
    %4 = vector.broadcast %3 : vector<1x32xf32> to vector<8x32xf32>
    %5 = arith.addf %2, %4 : vector<8x32xf32>
    %cst_5 = arith.constant 0.000000e+00 : f32
    %6 = vector.broadcast %cst_5 : f32 to vector<8x32xf32>
    %7 = arith.maximumf %5, %6 : vector<8x32xf32>
    %c0_6 = arith.constant 0 : index
    %c0_7 = arith.constant 0 : index
    %8 = vector.load %arg4[%c0_6, %c0_7] : memref<32x32xf32, #tpu.memory_space<vmem>>, vector<32x32xf32>
    %cst_8 = arith.constant dense<0.000000e+00> : vector<8x32xf32>
    %9 = tpu.matmul %7, %8, %cst_8 {dimension_numbers = #tpu.dot_dimension_numbers<[1], [0], [0], [1], [0, 0, 1, 1], [], []>} : vector<8x32xf32>, vector<32x32xf32>, vector<8x32xf32> -> vector<8x32xf32>
    %c0_9 = arith.constant 0 : index
    %c0_10 = arith.constant 0 : index
    %10 = vector.load %arg5[%c0_9, %c0_10] : memref<1x32xf32, #tpu.memory_space<vmem>>, vector<1x32xf32>
    %11 = vector.broadcast %10 : vector<1x32xf32> to vector<8x32xf32>
    %12 = arith.addf %9, %11 : vector<8x32xf32>
    %cst_11 = arith.constant 0.000000e+00 : f32
    %13 = vector.broadcast %cst_11 : f32 to vector<8x32xf32>
    %14 = arith.maximumf %12, %13 : vector<8x32xf32>
    %c0_12 = arith.constant 0 : index
    %c0_13 = arith.constant 0 : index
    %15 = vector.load %arg6[%c0_12, %c0_13] : memref<32x32xf32, #tpu.memory_space<vmem>>, vector<32x32xf32>
    %cst_14 = arith.constant dense<0.000000e+00> : vector<8x32xf32>
    %16 = tpu.matmul %14, %15, %cst_14 {dimension_numbers = #tpu.dot_dimension_numbers<[1], [0], [0], [1], [0, 0, 1, 1], [], []>} : vector<8x32xf32>, vector<32x32xf32>, vector<8x32xf32> -> vector<8x32xf32>
    %c0_15 = arith.constant 0 : index
    %c0_16 = arith.constant 0 : index
    %17 = vector.load %arg7[%c0_15, %c0_16] : memref<1x32xf32, #tpu.memory_space<vmem>>, vector<1x32xf32>
    %18 = vector.broadcast %17 : vector<1x32xf32> to vector<8x32xf32>
    %19 = arith.addf %16, %18 : vector<8x32xf32>
    %cst_17 = arith.constant 0.000000e+00 : f32
    %20 = vector.broadcast %cst_17 : f32 to vector<8x32xf32>
    %21 = arith.maximumf %19, %20 : vector<8x32xf32>
    %c0_18 = arith.constant 0 : index
    %c0_19 = arith.constant 0 : index
    %22 = vector.load %arg8[%c0_18, %c0_19] : memref<1x32xf32, #tpu.memory_space<vmem>>, vector<1x32xf32>
    %23 = vector.broadcast %22 : vector<1x32xf32> to vector<8x32xf32>
    %24 = arith.mulf %21, %23 : vector<8x32xf32>
    %cst_20 = arith.constant dense<0.000000e+00> : vector<8xf32>
    %25 = vector.multi_reduction <add>, %24, %cst_20 [1] : vector<8x32xf32> to vector<8xf32>
    %26 = vector.shape_cast %25 : vector<8xf32> to vector<8x1xf32>
    %c0_21 = arith.constant 0 : index
    %c0_22 = arith.constant 0 : index
    %27 = vector.load %arg9[%c0_21, %c0_22] : memref<1x1xf32, #tpu.memory_space<vmem>>, vector<1x1xf32>
    %28 = vector.broadcast %27 : vector<1x1xf32> to vector<8x1xf32>
    %29 = arith.addf %26, %28 : vector<8x1xf32>
    %30 = arith.mulf %29, %29 : vector<8x1xf32>
    %cst_23 = arith.constant dense<0.000000e+00> : vector<1xf32>
    %31 = vector.multi_reduction <add>, %30, %cst_23 [0] : vector<8x1xf32> to vector<1xf32>
    %32 = vector.shape_cast %31 : vector<1xf32> to vector<1x1xf32>
    %33 = vector.shape_cast %32 : vector<1x1xf32> to vector<1x1x1xf32>
    %34 = vector.shape_cast %33 : vector<1x1x1xf32> to vector<1x1x1xf32>
    %35 = vector.broadcast %34 : vector<1x1x1xf32> to vector<1x8x128xf32>
    %c0_24 = arith.constant 0 : index
    %c0_25 = arith.constant 0 : index
    %c0_26 = arith.constant 0 : index
    %36 = vector.load %arg10[%c0_24, %c0_25, %c0_26] : memref<1x8x128xf32, #tpu.memory_space<vmem>>, vector<1x8x128xf32>
    tpu.vector_store %arg10[%c0_24, %c0_25, %c0_26], %35 {strides = array<i32>} : memref<1x8x128xf32, #tpu.memory_space<vmem>>, vector<1x8x128xf32>,
    return
  }
  func.func @transform_0(%arg0: i32) -> (i32, i32) {
    %c0_i32 = arith.constant 0 : i32
    %c0_i32_0 = arith.constant 0 : i32
    return %arg0, %c0_i32 : i32, i32
  }
  func.func @transform_1(%arg0: i32) -> (i32, i32) {
    %c0_i32 = arith.constant 0 : i32
    %c0_i32_0 = arith.constant 0 : i32
    %c0_i32_1 = arith.constant 0 : i32
    return %c0_i32, %c0_i32_0 : i32, i32
  }
  func.func @transform_2(%arg0: i32) -> (i32, i32) {
    %c0_i32 = arith.constant 0 : i32
    %c0_i32_0 = arith.constant 0 : i32
    %c0_i32_1 = arith.constant 0 : i32
    return %c0_i32, %c0_i32_0 : i32, i32
  }
  func.func @transform_3(%arg0: i32) -> (i32, i32) {
    %c0_i32 = arith.constant 0 : i32
    %c0_i32_0 = arith.constant 0 : i32
    %c0_i32_1 = arith.constant 0 : i32
    return %c0_i32, %c0_i32_0 : i32, i32
  }
  func.func @transform_4(%arg0: i32) -> (i32, i32) {
    %c0_i32 = arith.constant 0 : i32
    %c0_i32_0 = arith.constant 0 : i32
    %c0_i32_1 = arith.constant 0 : i32
    return %c0_i32, %c0_i32_0 : i32, i32
  }
  func.func @transform_5(%arg0: i32) -> (i32, i32) {
    %c0_i32 = arith.constant 0 : i32
    %c0_i32_0 = arith.constant 0 : i32
    %c0_i32_1 = arith.constant 0 : i32
    return %c0_i32, %c0_i32_0 : i32, i32
  }
  func.func @transform_6(%arg0: i32) -> (i32, i32) {
    %c0_i32 = arith.constant 0 : i32
    %c0_i32_0 = arith.constant 0 : i32
    %c0_i32_1 = arith.constant 0 : i32
    return %c0_i32, %c0_i32_0 : i32, i32
  }
  func.func @transform_7(%arg0: i32) -> (i32, i32) {
    %c0_i32 = arith.constant 0 : i32
    %c0_i32_0 = arith.constant 0 : i32
    %c0_i32_1 = arith.constant 0 : i32
    return %c0_i32, %c0_i32_0 : i32, i32
  }
  func.func @transform_8(%arg0: i32) -> (i32, i32) {
    %c0_i32 = arith.constant 0 : i32
    %c0_i32_0 = arith.constant 0 : i32
    %c0_i32_1 = arith.constant 0 : i32
    return %c0_i32, %c0_i32_0 : i32, i32
  }
  func.func @transform_9(%arg0: i32) -> (i32, i32, i32) {
    %c0_i32 = arith.constant 0 : i32
    %c0_i32_0 = arith.constant 0 : i32
    %c0_i32_1 = arith.constant 0 : i32
    return %arg0, %c0_i32, %c0_i32_0 : i32, i32, i32
  }
}

</mosaic_0001>

<bundles_post_ra>
// kernel: tpu_custom_call.1
= control target key start
LH: loop header
LB: loop body
LE: loop exit
PB: predicated region body
PF: predicated region fallthrough
CT: control target
= control target key end

     0   :  { %s481_s0 = inlined_call_operand.hbm [shape: f32[8,10], index: 0, kind: input, shape index: {}]   ;;  %s482_s1 = inlined_call_operand.hbm [shape: f32[10,32], index: 1, kind: input, shape index: {}]   ;;  %s483_s2 = inlined_call_operand.vmem [shape: f32[1,32], index: 2, kind: input, shape index: {}]   ;;  %s484_s3 = inlined_call_operand.hbm [shape: f32[32,32], index: 3, kind: input, shape index: {}]   ;;  %s485_s4 = inlined_call_operand.vmem [shape: f32[1,32], index: 4, kind: input, shape index: {}]   ;;  %s486_s5 = inlined_call_operand.hbm [shape: f32[32,32], index: 5, kind: input, shape index: {}]   ;;  %s487_s6 = inlined_call_operand.vmem [shape: f32[1,32], index: 6, kind: input, shape index: {}]   ;;  %s488_s7 = inlined_call_operand.vmem [shape: f32[1,32], index: 7, kind: input, shape index: {}]   ;;  %s489_s8 = inlined_call_operand.<no memory space> [shape: f32[1,1], index: 8, kind: input, shape index: {}]   ;;  %s490_s9 = inlined_call_operand.hbm [shape: f32[1,8,128], index: 9, kind: output, shape index: {}]  }
   0x1   :  { %v14_v0 = vstv %s489_s8 }
   0x2   :  { %15 = vst [vmem:[#allocation2] sm:$0x1] %v14_v0 }
   0x3   :  { %16 = vsyncpa [#allocation4], 0 }
   0x4   :  { %17 = vsyncpa [#allocation7], 0 }
   0x5   :  { %18 = vsyncpa [#allocation10], 0  ;;  %s35_s13 = sshll.u32 %s482_s1, 4  ;;  %s36_s13 = int_to_ptr.hbm [resolvable:$true] %s35_s13 }
   0x6   :  { %19 = vsyncpa [#allocation5], 0  ;;  %s390_s14 = smov [#allocation6]   ;;  %s25_s18 = sshll.u32 %s481_s0, 4  ;;  %s26_s18 = int_to_ptr.hbm [resolvable:$true] %s25_s18 }
   0x7   :  { %s37_s15 = sshll.u32 %s390_s14, 4  ;;  %s391_s19 = smov 128   ;;  %s38_s15 = int_to_ptr.vmem [resolvable:$true] %s37_s15 }
   0x8   :  { %s392_s20 = smov 8   ;;  %s393_s8 = smov [#allocation3]  }
   0x9   :  { %43 = dma.hbm_to_vmem [thread:$0]  %s36_s13, 256, %s38_s15, [#allocation7], %s391_s19, %s391_s19, %s392_s20  }
   0xa   :  { %s27_s21 = sshll.u32 %s393_s8, 4  ;;  %s50_s24 = sshll.u32 %s484_s3, 4  ;;  %s28_s21 = int_to_ptr.vmem [resolvable:$true] %s27_s21  ;;  %s51_s24 = int_to_ptr.hbm [resolvable:$true] %s50_s24 }
   0xb   :  { %30 = dma.hbm_to_vmem [thread:$0]  %s26_s18, 128, %s28_s21, [#allocation4]  }
   0xc   :  { %s65_s26 = sshll.u32 %s486_s5, 4  ;;  %s394_s27 = smov [#allocation8]   ;;  %s66_s26 = int_to_ptr.hbm [resolvable:$true] %s65_s26 }
   0xd   :  { %s52_s28 = sshll.u32 %s394_s27, 4  ;;  %s395_s0 = smov [#allocation9]   ;;  %s53_s28 = int_to_ptr.vmem [resolvable:$true] %s52_s28 }
   0xe   :  { %58 = dma.hbm_to_vmem [thread:$0]  %s51_s24, 512, %s53_s28, [#allocation7], %s391_s19, %s391_s19, %s392_s20  }
   0xf   :  { %s67_s29 = sshll.u32 %s395_s0, 4  ;;  %s68_s29 = int_to_ptr.vmem [resolvable:$true] %s67_s29 }
  0x10   :  { %73 = dma.hbm_to_vmem [thread:$0]  %s66_s26, 512, %s68_s29, [#allocation10], %s391_s19, %s391_s19, %s392_s20  }
  0x11   :  { %382 = dma.done.wait [#allocation4], 128  }
  0x12   :  { %383 = vsyncadd [#allocation4], 4294967168 }
  0x13   :  { %384 = dma.done.wait [#allocation7], 768  }
  0x14   :  { %385 = vsyncadd [#allocation7], 4294966528 }
  0x15   :  { %386 = dma.done.wait [#allocation10], 512  }
  0x16   :  { %387 = vsyncadd [#allocation10], 4294966784  ;;  %vm107_vm0 = vcmask 1041408   ;;  %v98_v1 = vld [vmem:[#allocation6 + $0x8] sm:$0x3]  ;;  %v97_v2 = vld [vmem:[#allocation6] sm:$0xff] }
  0x17   :  { %244 = vmatpush.msk.msra.mxu0 %vm107_vm0, %v98_v1  ;;  %v96_v3 = vld [vmem:[#allocation3] sm:$0xff]  ;;  %vm103_vm1 = vcmask 80896   ;;  %v135_v4 = vld [vmem:[#allocation8 + $0x18] sm:$0xff]  ;;  %v134_v5 = vld [vmem:[#allocation8 + $0x10] sm:$0xff]  ;;  %vm140_vm2 = vcmask 261120   ;;  %v396_v27 = vmov 0  }
  0x18   :  { %156 = vmatpush.msra.mxu1 %v135_v4  ;;  %v133_v6 = vld [vmem:[#allocation8 + $0x8] sm:$0xff]  ;;  %v132_v7 = vld [vmem:[#allocation8] sm:$0xff]  ;;  %v168_v8 = vld [vmem:[#allocation9 + $0x18] sm:$0xff]  ;;  %256 = vset.pattern.permute.xlu0 %v396_v27  ;;  %vm211_vm3 = vcmask 7168   ;;  %s232_s15 = sshll.u32 %s490_s9, 4  ;;  %s233_s15 = int_to_ptr.hbm [resolvable:$true] %s232_s15 }
  0x19   :  { %126 = vmatpush.msra.mxu0 %v97_v2  ;;  %188 = vmatpush.msra.mxu2 %v168_v8  ;;  %v257_v9 = vld [vmem:[%s483_s2] ss:$0 sm:$0xff]  ;;  %v167_v13 = vld [vmem:[#allocation9 + $0x10] sm:$0xff]  ;;  %v166_v14 = vld [vmem:[#allocation9 + $0x8] sm:$0xff] }
  0x1a   :  { %245 = vmatmul.msk.f32.vlgmr.msra.gmra.mxu0 %vm103_vm1, %v96_v3  ;;  %157 = vmatpush.msra.mxu1 %v134_v5  ;;  %v165_v15 = vld [vmem:[#allocation9] sm:$0xff] }
  0x1b   :  { %189 = vmatpush.msra.mxu2 %v167_v13  ;;  %v258_v16 = vld [vmem:[%s485_s4] ss:$0 sm:$0xff]  ;;  %s397_s4 = smov [#allocation11]  }
  0x1c   :  { %158 = vmatpush.msra.mxu1 %v133_v6  ;;  %v259_v20 = vld [vmem:[%s487_s6] ss:$0 sm:$0xff]  ;;  %s230_s6 = sshll.u32 %s397_s4, 4  ;;  %s231_s6 = int_to_ptr.vmem [resolvable:$true] %s230_s6 }
  0x1d   :  { %190 = vmatpush.msra.mxu2 %v166_v14  ;;  %v260_v23 = vld [vmem:[%s488_s7] ss:$0 sm:$0xff] }
  0x1e   :  { %159 = vmatpush.msra.mxu1 %v132_v7  ;;  %v261_v28 = vld [vmem:[#allocation2] ss:$0 sm:$0xff] }
  0x1f   :  { %191 = vmatpush.msra.mxu2 %v165_v15 }
  0x97   :  { %v128_v10 = vpop.f32.mrf.mxu0 }
  0x98   :  { %v129_v11 = vadd.f32 %v257_v9, %v128_v10 }
  0x9a   :  { %v131_v12 = vmax.f32 %v129_v11, 0.0 }
  0x9c   :  { %246 = vmatmul.msk.f32.vlgmr.msra.gmra.mxu1 %vm140_vm2, %v131_v12 }
 0x119   :  { %v161_v17 = vpop.f32.mrf.mxu1 }
 0x11a   :  { %v162_v18 = vadd.f32 %v258_v16, %v161_v17 }
 0x11c   :  { %v164_v19 = vmax.f32 %v162_v18, 0.0 }
 0x11e   :  { %247 = vmatmul.msk.f32.vlgmr.msra.gmra.mxu2 %vm140_vm2, %v164_v19 }
 0x1a1   :  { %v193_v21 = vpop.f32.mrf.mxu2 }
 0x1a2   :  { %v194_v22 = vadd.f32 %v259_v20, %v193_v21 }
 0x1a4   :  { %v196_v24 = vmax.f32 %v194_v22, 0.0 }
 0x1a6   :  { %v201_v25 = vmul.f32 %v260_v23, %v196_v24 }
 0x1a8   :  { %v202_v26 = vsel %vm140_vm2, %v201_v25, 0.0 }
 0x1a9   :  { %203 = vadd.xlane.f32.xlu0 %v202_v26 }
 0x21c   :  { %v204_v29 = vpop.xlane.xlu0 %203 }
 0x21d   :  { %v209_v30 = vadd.f32 %v261_v28, %v204_v29 }
 0x21f   :  { %v210_v31 = vmul.f32 %v209_v30, %v209_v30 }
 0x221   :  { %v212_v32 = vsel %vm211_vm3, %v210_v31, 0.0 }
 0x222   :  { %v213_v33 = vrot.slane %v212_v32, 4 }
 0x224   :  { %v214_v34 = vadd.f32 %v213_v33, %v212_v32 }
 0x226   :  { %v215_v35 = vrot.slane %v214_v34, 2 }
 0x228   :  { %v216_v36 = vadd.f32 %v215_v35, %v214_v34 }
 0x22a   :  { %v217_v37 = vrot.slane %v216_v36, 1 }
 0x22c   :  { %v218_v38 = vadd.f32 %v217_v37, %v216_v36 }
 0x22e   :  { %221 = vperm.xlu0 %256, %v218_v38  }
 0x2a0   :  { %v222_v39 = vpop.permute.xlu0 %221 }
 0x2a1   :  { %224 = vst [vmem:[#allocation11] sm:$0xff] %v222_v39 }
 0x2a2   :  { %235 = dma.vmem_to_hbm [thread:$0]  %s231_s6, 128, %s233_s15, [#allocation5]  }
 0x2a3   :  { %388 = dma.done.wait [#allocation5], 128  }
 0x2a4   :  { %389 = vsyncadd [#allocation5], 4294967168 }
 0x2a5   :  { %240 = vsyncpa [#allocation4], 1 }
 0x2a6   :  { %241 = vsyncpa [#allocation7], 1 }
 0x2a7   :  { %242 = vsyncpa [#allocation10], 1 }
 0x2a8   :  { %243 = vsyncpa [#allocation5], 1 }

</bundles_post_ra>
